<compile_context>
chip_gen: v6e
topology: v6e:2x2x1
jax: 0.10.0
libtpu: 0.0.40
codegen_flags: <defaults>
</compile_context>

<pallas_src>
import jax
import jax.numpy as jnp
from jax.experimental import pallas as pl
from jax.experimental.pallas import tpu as pltpu


def _round_up(v, m):
    return ((v + m - 1) // m) * m


def _vmem_budget_bytes():
    """~80% of physical VMEM; conservative 64 MiB assumption if unknown."""
    phys = 64 * 1024 * 1024
    try:
        phys = int(pltpu.get_tpu_info().vmem_capacity_bytes)
    except Exception:
        pass
    budget = min(int(phys * 0.80), phys - (8 << 20))
    return max(budget, 32 << 20)


def _tile_targets(budget):
    # 128 MiB-class chips (v5e/v6e): go big to cut W re-streaming.
    # 64 MiB-class (v7x) / unknown: smaller targets re-derived for 64 MiB.
    if budget >= (96 << 20):
        return 1024, 1024
    return 768, 768


def _pick_dim_tile(dim, target):
    """Largest tile <= target dividing `dim` (dim is a multiple of 128),
    preferring 256-multiples (v6e/v7x MXU is 2x256^2)."""
    target = max(128, min(target, dim))
    if dim % 256 == 0:
        t = (target // 256) * 256
        while t >= 256:
            if dim % t == 0:
                return t
            t -= 256
    t = (target // 128) * 128
    while dim % t != 0:
        t -= 128
    return t


def _plan_tiles(M, Dp, budget, r_isz, o_isz, tm_target, tn_target):
    """Pick (tm, tn, tk, Mp, k_collapsed) within the VMEM budget."""
    bf = 2  # bf16 itemsize

    def footprint(tm, tn, tk, ktiled):
        f = 2 * tm * tk * bf                   # x LHS tiles (double-buffered)
        f += 2 * tk * tn * bf                  # W tiles
        f += 2 * tn * 4                        # bias (f32)
        f += 2 * tm * tn * (r_isz + o_isz)     # residual in + output
        if ktiled:
            f += tm * tn * 4                   # f32 accumulator scratch
        return f

    tn = _pick_dim_tile(Dp, tn_target)

    m16 = _round_up(M, 16)                     # bf16 sublane packing
    tm = max(16, (min(tm_target, m16) // 16) * 16)
    # Keep row padding bounded (< ~25% of M).
    while tm > 16 and _round_up(m16, tm) - m16 > max(m16 // 4, 16):
        tm = max(16, ((tm // 2) // 16) * 16)

    # --- primary path: collapse the K reduction (tk = Dp) -------------------
    tm_c = tm
    while tm_c > 128 and footprint(tm_c, tn, Dp, False) > budget:
        tm_c = max(128, ((tm_c // 2) // 16) * 16)
    if footprint(tm_c, tn, Dp, False) <= budget:
        tm, tk, k_collapsed = tm_c, Dp, True
    else:
        # --- fallback: K-tiled with an accumulator (very large D) ----------
        k_collapsed = False
        tk = _pick_dim_tile(Dp, 512)
        while tn > 128 and footprint(tm, tn, tk, True) > budget:
            tn = _pick_dim_tile(Dp, max(128, tn // 2))
        while tm > 16 and footprint(tm, tn, tk, True) > budget:
            tm = max(16, ((tm // 2) // 16) * 16)

    Mp = _round_up(m16, tm)
    # v7x megacore: make sure the leading "parallel" M axis has >= 2 tiles on
    # calls big enough to matter (2 TensorCores per chip).
    if Mp // tm == 1 and Mp % 32 == 0 and Mp // 2 >= 128:
        tm = Mp // 2
    return tm, tn, tk, Mp, k_collapsed


# ---------------------------------------------------------------------------
# Kernels
# ---------------------------------------------------------------------------
def _resblock_kernel_fused(x_ref, w_ref, b_ref, r_ref, o_ref):
    """Whole-K matmul + bias + relu + residual in one grid step (no scratch)."""
    acc = jnp.dot(x_ref[...], w_ref[...], preferred_element_type=jnp.float32)
    h = jnp.maximum(acc + b_ref[...].astype(jnp.float32), 0.0)
    o_ref[...] = (h + r_ref[...].astype(jnp.float32)).astype(o_ref.dtype)


def _resblock_kernel_ktiled(x_ref, w_ref, b_ref, r_ref, o_ref, acc_ref):
    """K-tiled fallback: f32 VMEM accumulator, epilogue at the last k step."""
    k = pl.program_id(2)

    @pl.when(k == 0)
    def _():
        acc_ref[...] = jnp.zeros_like(acc_ref)

    acc_ref[...] += jnp.dot(x_ref[...], w_ref[...],
                            preferred_element_type=jnp.float32)

    @pl.when(k == pl.num_programs(2) - 1)
    def _():
        h = jnp.maximum(acc_ref[...] + b_ref[...].astype(jnp.float32), 0.0)
        o_ref[...] = (h + r_ref[...].astype(jnp.float32)).astype(o_ref.dtype)


# ---------------------------------------------------------------------------
# Wrappers
# ---------------------------------------------------------------------------
def prepare_resblock_params(w, b):
    """Pad fn's parameters to lane-dense (128-multiple) width and cast the
    weight to bf16 ONCE, off the per-call hot path."""
    D = w.shape[0]
    Dp = _round_up(D, 128)
    if Dp != D:
        w = jnp.pad(w, ((0, Dp - D), (0, Dp - D)))
        b = jnp.pad(b, ((0, Dp - D),))
    return w.astype(jnp.bfloat16), b.astype(jnp.float32).reshape(1, Dp)


def resblock_forward(x, w_bf16, b_f32):
    """out = relu(x @ W + b) + x fused in one Pallas kernel.

    x: (B, S, D); w_bf16 (Dp, Dp) and b_f32 (1, Dp) from
    prepare_resblock_params.
    """
    B, S, D = x.shape
    Dp = w_bf16.shape[0]
    M = B * S
    out_dtype = x.dtype
    r_isz = jnp.dtype(out_dtype).itemsize
    o_isz = r_isz

    budget = _vmem_budget_bytes()
    tm_t, tn_t = _tile_targets(budget)
    tm, tn, tk, Mp, k_collapsed = _plan_tiles(M, Dp, budget, r_isz, o_isz,
                                              tm_t, tn_t)

    # Hot-path prep: flatten, minimal row/lane pad, bf16 LHS.
    x2 = x.reshape(M, D)
    if (Mp, Dp) != (M, D):
        x2 = jnp.pad(x2, ((0, Mp - M), (0, Dp - D)))
    x_lhs = x2.astype(jnp.bfloat16)

    grid_m, grid_n = Mp // tm, Dp // tn

    cost = pl.CostEstimate(
        flops=2 * Mp * Dp * Dp,
        transcendentals=0,
        bytes_accessed=(Dp * Dp * 2 * grid_m      # W streamed once per row panel
                        + Mp * Dp * 2 * grid_n    # bf16 LHS re-read per N tile
                        + Dp * 4 * grid_m         # bias
                        + Mp * Dp * r_isz         # residual
                        + Mp * Dp * o_isz),       # output
    )

    if k_collapsed:
        grid = (grid_m, grid_n)
        in_specs = [
            pl.BlockSpec((tm, Dp), lambda i, j: (i, 0)),   # x LHS (bf16)
            pl.BlockSpec((Dp, tn), lambda i, j: (0, j)),   # W (bf16)
            pl.BlockSpec((1, tn), lambda i, j: (0, j)),    # bias (f32)
            pl.BlockSpec((tm, tn), lambda i, j: (i, j)),   # residual
        ]
        out_specs = pl.BlockSpec((tm, tn), lambda i, j: (i, j))
        scratch_shapes = []
        kernel = _resblock_kernel_fused
        dim_sem = ("parallel", "parallel")
    else:
        grid = (grid_m, grid_n, Dp // tk)
        in_specs = [
            pl.BlockSpec((tm, tk), lambda i, j, k: (i, k)),
            pl.BlockSpec((tk, tn), lambda i, j, k: (k, j)),
            pl.BlockSpec((1, tn), lambda i, j, k: (0, j)),
            pl.BlockSpec((tm, tn), lambda i, j, k: (i, j)),
        ]
        out_specs = pl.BlockSpec((tm, tn), lambda i, j, k: (i, j))
        scratch_shapes = [pltpu.VMEM((tm, tn), jnp.float32)]
        kernel = _resblock_kernel_ktiled
        dim_sem = ("parallel", "parallel", "arbitrary")

    out = pl.pallas_call(
        kernel,
        out_shape=jax.ShapeDtypeStruct((Mp, Dp), out_dtype),
        grid_spec=pltpu.PrefetchScalarGridSpec(
            num_scalar_prefetch=0,
            grid=grid,
            in_specs=in_specs,
            out_specs=out_specs,
            scratch_shapes=scratch_shapes,
        ),
        compiler_params=pltpu.CompilerParams(
            dimension_semantics=dim_sem,
            vmem_limit_bytes=budget,
        ),
        cost_estimate=cost,
    )(x_lhs, w_bf16, b_f32, x2)

    return out[:M, :D].reshape(B, S, D)


if __name__ == "__main__":
    # TODO(synk): ResBlock wraps an arbitrary user-supplied `fn`; here it is
    # instantiated with a representative fn(x) = relu(x @ W + b).
    B, S, D = 2, 8, 32
    key = jax.random.PRNGKey(0)
    kx, kw, kb = jax.random.split(key, 3)

    x = jax.random.normal(kx, (B, S, D), dtype=jnp.float32)
    w = jax.random.normal(kw, (D, D), dtype=jnp.float32) * 0.1
    b = jax.random.normal(kb, (D,), dtype=jnp.float32) * 0.1

    w_p, b_p = prepare_resblock_params(w, b)   # pad + bf16-cast once
    y = resblock_forward(x, w_p, b_p)
    jax.block_until_ready(y)

    # Pure-JAX reference: relu(x @ W + b) + x.  bf16 MXU operands -> loosened
    # tolerance vs. the f32 reference.
    ref = jnp.maximum(jnp.einsum("bsd,de->bse", x, w) + b, 0.0) + x
    assert jnp.allclose(y, ref, atol=3e-2, rtol=3e-2), "mismatch vs reference"

    print("KERNEL_OK")
</pallas_src>

<mosaic_0001>
module attributes {stable_mosaic.version = 11 : i64} {
  func.func @_resblock_kernel_fused(%arg0: i32, %arg1: i32, %arg2: memref<16x128xbf16, #tpu.memory_space<vmem>>, %arg3: memref<128x128xbf16, #tpu.memory_space<vmem>>, %arg4: memref<1x128xf32, #tpu.memory_space<vmem>>, %arg5: memref<16x128xf32, #tpu.memory_space<vmem>>, %arg6: memref<16x128xf32, #tpu.memory_space<vmem>>) attributes {dimension_semantics = [#tpu.dimension_semantics<parallel>, #tpu.dimension_semantics<parallel>], iteration_bounds = array<i64: 1, 1>, scalar_prefetch = 0 : i64, scratch_operands = 0 : i64, tpu.core_type = #tpu.core_type<tc>, window_params = [{transform_indices = @transform_0, window_bounds = array<i64: 16, 128>}, {transform_indices = @transform_1, window_bounds = array<i64: 128, 128>}, {transform_indices = @transform_2, window_bounds = array<i64: 1, 128>}, {transform_indices = @transform_3, window_bounds = array<i64: 16, 128>}, {transform_indices = @transform_4, window_bounds = array<i64: 16, 128>}]} {
    %c0 = arith.constant 0 : index
    %c0_0 = arith.constant 0 : index
    %0 = vector.load %arg2[%c0, %c0_0] : memref<16x128xbf16, #tpu.memory_space<vmem>>, vector<16x128xbf16>
    %c0_1 = arith.constant 0 : index
    %c0_2 = arith.constant 0 : index
    %1 = vector.load %arg3[%c0_1, %c0_2] : memref<128x128xbf16, #tpu.memory_space<vmem>>, vector<128x128xbf16>
    %cst = arith.constant dense<0.000000e+00> : vector<16x128xf32>
    %2 = tpu.matmul %0, %1, %cst {dimension_numbers = #tpu.dot_dimension_numbers<[1], [0], [0], [1], [0, 0, 1, 1], [], []>} : vector<16x128xbf16>, vector<128x128xbf16>, vector<16x128xf32> -> vector<16x128xf32>
    %c0_3 = arith.constant 0 : index
    %c0_4 = arith.constant 0 : index
    %3 = vector.load %arg4[%c0_3, %c0_4] : memref<1x128xf32, #tpu.memory_space<vmem>>, vector<1x128xf32>
    %4 = vector.broadcast %3 : vector<1x128xf32> to vector<16x128xf32>
    %5 = arith.addf %2, %4 : vector<16x128xf32>
    %cst_5 = arith.constant 0.000000e+00 : f32
    %6 = vector.broadcast %cst_5 : f32 to vector<16x128xf32>
    %7 = arith.maximumf %5, %6 : vector<16x128xf32>
    %c0_6 = arith.constant 0 : index
    %c0_7 = arith.constant 0 : index
    %8 = vector.load %arg5[%c0_6, %c0_7] : memref<16x128xf32, #tpu.memory_space<vmem>>, vector<16x128xf32>
    %9 = arith.addf %7, %8 : vector<16x128xf32>
    %c0_8 = arith.constant 0 : index
    %c0_9 = arith.constant 0 : index
    %10 = vector.load %arg6[%c0_8, %c0_9] : memref<16x128xf32, #tpu.memory_space<vmem>>, vector<16x128xf32>
    tpu.vector_store %arg6[%c0_8, %c0_9], %9 {strides = array<i32>} : memref<16x128xf32, #tpu.memory_space<vmem>>, vector<16x128xf32>,
    return
  }
  func.func @transform_0(%arg0: i32, %arg1: i32) -> (i32, i32) {
    %c0_i32 = arith.constant 0 : i32
    %c0_i32_0 = arith.constant 0 : i32
    return %arg0, %c0_i32 : i32, i32
  }
  func.func @transform_1(%arg0: i32, %arg1: i32) -> (i32, i32) {
    %c0_i32 = arith.constant 0 : i32
    %c0_i32_0 = arith.constant 0 : i32
    return %c0_i32, %arg1 : i32, i32
  }
  func.func @transform_2(%arg0: i32, %arg1: i32) -> (i32, i32) {
    %c0_i32 = arith.constant 0 : i32
    %c0_i32_0 = arith.constant 0 : i32
    return %c0_i32, %arg1 : i32, i32
  }
  func.func @transform_3(%arg0: i32, %arg1: i32) -> (i32, i32) {
    %c0_i32 = arith.constant 0 : i32
    return %arg0, %arg1 : i32, i32
  }
  func.func @transform_4(%arg0: i32, %arg1: i32) -> (i32, i32) {
    %c0_i32 = arith.constant 0 : i32
    return %arg0, %arg1 : i32, i32
  }
}

</mosaic_0001>

<bundles_post_ra>
// kernel: tpu_custom_call.1
= control target key start
LH: loop header
LB: loop body
LE: loop exit
PB: predicated region body
PF: predicated region fallthrough
CT: control target
= control target key end

     0   :  { %9 = vsyncpa [#allocation3], 0  ;;  %s406_s0 = inlined_call_operand.hbm [shape: bf16[16,128], index: 0, kind: input, shape index: {}]   ;;  %s407_s1 = inlined_call_operand.hbm [shape: bf16[128,128], index: 1, kind: input, shape index: {}]   ;;  %s408_s2 = inlined_call_operand.vmem [shape: f32[1,128], index: 2, kind: input, shape index: {}]   ;;  %s409_s3 = inlined_call_operand.hbm [shape: f32[16,128], index: 3, kind: input, shape index: {}]   ;;  %s410_s4 = inlined_call_operand.hbm [shape: f32[16,128], index: 4, kind: output, shape index: {}]  }
   0x1   :  { %10 = vsyncpa [#allocation6], 0 }
   0x2   :  { %11 = vsyncpa [#allocation4], 0  ;;  %s350_s15 = smov [#allocation5]   ;;  %s351_s17 = smov [#allocation2]  }
   0x3   :  { %s29_s16 = sshll.u32 %s350_s15, 4  ;;  %s17_s18 = sshll.u32 %s351_s17, 4  ;;  %s30_s16 = int_to_ptr.vmem [resolvable:$true] %s29_s16  ;;  %s18_s18 = int_to_ptr.vmem [resolvable:$true] %s17_s18 }
   0x4   :  { %s272_s19 = scalar_lea.vmem %s30_s16, 1024  ;;  %p277_p1 = scmp.lt.s32.totalorder %s30_s16, %s30_s16 }
   0x5   :  { %p273_p0 = scmp.ne.s32.totalorder %s30_s16, %s272_s19  ;;  %p278_p2 = scmp.lt.s32.totalorder %s272_s19, %s272_s19 }
   0x7   :  { %p279_p3 = por %p278_p2, %p277_p1 }
   0x9   :  { %p280_p4 = pnand %p279_p3, %p273_p0 }
   0xb   :  { %283 = shalt.err (!%p280_p4)
}
   0xc   :  { %s352_s20 = smov 64   ;;  %s353_s21 = smov 4  }
   0xd   :  { %35 = dma.hbm_to_vmem [thread:$0]  %s407_s1, 1024, %s30_s16, [#allocation6], %s352_s20, %s352_s20, %s353_s21  }
   0xe   :  { %s292_s24 = scalar_lea.vmem %s18_s18, 128  ;;  %p297_p6 = scmp.lt.s32.totalorder %s18_s18, %s18_s18 }
   0xf   :  { %p293_p5 = scmp.ne.s32.totalorder %s18_s18, %s292_s24  ;;  %p298_p7 = scmp.lt.s32.totalorder %s292_s24, %s292_s24 }
  0x11   :  { %p299_p8 = por %p298_p7, %p297_p6 }
  0x13   :  { %p300_p9 = pnand %p299_p8, %p293_p5 }
  0x15   :  { %303 = shalt.err (!%p300_p9)
}
  0x16   :  { %23 = dma.hbm_to_vmem [thread:$0]  %s406_s0, 128, %s18_s18, [#allocation3], %s352_s20, %s352_s20, %s353_s21  }
  0x17   :  { %s354_s27 = smov [#allocation7]  }
  0x18   :  { %s43_s28 = sshll.u32 %s354_s27, 4  ;;  %s44_s28 = int_to_ptr.vmem [resolvable:$true] %s43_s28 }
  0x19   :  { %s312_s29 = scalar_lea.vmem %s44_s28, 256  ;;  %p317_p11 = scmp.lt.s32.totalorder %s44_s28, %s44_s28 }
  0x1a   :  { %p313_p10 = scmp.ne.s32.totalorder %s44_s28, %s312_s29  ;;  %p318_p12 = scmp.lt.s32.totalorder %s312_s29, %s312_s29 }
  0x1c   :  { %p319_p13 = por %p318_p12, %p317_p11 }
  0x1e   :  { %p320_p0 = pnand %p319_p13, %p313_p10 }
  0x20   :  { %323 = shalt.err (!%p320_p0)
}
  0x21   :  { %s355_s1 = smov 128   ;;  %s356_s30 = smov 8  }
  0x22   :  { %49 = dma.hbm_to_vmem [thread:$0]  %s409_s3, 256, %s44_s28, [#allocation6], %s355_s1, %s355_s1, %s356_s30  }
  0x23   :  { %344 = dma.done.wait [#allocation3], 128  }
  0x24   :  { %345 = vsyncadd [#allocation3], 4294967168 }
  0x25   :  { %346 = dma.done.wait [#allocation6], 1280  }
  0x26   :  { %347 = vsyncadd [#allocation6], 4294966016  ;;  %v357_v0 = vmov 0.0   ;;  %vm358_vm0 = vmmov 0   ;;  %v255_v1 = vld [vmem:[#allocation5 + $0x38] sm:$0xff]   ;;  %v256_v2 = vld [vmem:[#allocation5 + $0x30] sm:$0xff]  }
  0x27   :  { %225 = vmatprep.subr.bf16.mxu0 %v357_v0  ;;  %241 = vmatprep.mubr.msk.bf16.mxu0 %vm358_vm0, %v357_v0  ;;  %v257_v3 = vld [vmem:[#allocation5 + $0x28] sm:$0xff]   ;;  %v258_v4 = vld [vmem:[#allocation5 + $0x20] sm:$0xff]   ;;  %v259_v5 = vld [vmem:[#allocation5 + $0x18] sm:$0xff]   ;;  %s359_s7 = smov [#allocation8]  }
  0x28   :  { %226 = vmatpush3.bf16.msra.mxu0 %v255_v1  ;;  %v260_v6 = vld [vmem:[#allocation5 + $0x10] sm:$0xff]   ;;  %v261_v7 = vld [vmem:[#allocation5 + $0x8] sm:$0xff]   ;;  %v262_v8 = vld [vmem:[#allocation5] sm:$0xff]   ;;  %s193_s8 = sshll.u32 %s359_s7, 4  ;;  %s194_s8 = int_to_ptr.vmem [resolvable:$true] %s193_s8 }
  0x29   :  { %227 = vmatprep.subr.bf16.mxu0 %v357_v0  ;;  %v263_v9 = vld [vmem:[#allocation2] sm:$0xff]   ;;  %v182_v13 = vld [vmem:[#allocation7] sm:$0xff]  ;;  %v183_v19 = vld [vmem:[#allocation7 + $0x8] sm:$0xff]  ;;  %s324_s9 = scalar_lea.vmem %s194_s8, 256  ;;  %p329_p2 = scmp.lt.s32.totalorder %s194_s8, %s194_s8 }
  0x2a   :  { %v206_v10 = vld [vmem:[%s408_s2] ss:$0 sm:$0xff]  ;;  %p325_p1 = scmp.ne.s32.totalorder %s194_s8, %s324_s9  ;;  %p330_p3 = scmp.lt.s32.totalorder %s324_s9, %s324_s9 }
  0x2c   :  { %228 = vmatpush3.bf16.msra.mxu0 %v256_v2  ;;  %p331_p4 = por %p330_p3, %p329_p2 }
  0x2d   :  { %229 = vmatprep.subr.bf16.mxu0 %v357_v0 }
  0x2e   :  { %p332_p5 = pnand %p331_p4, %p325_p1 }
  0x30   :  { %230 = vmatpush3.bf16.msra.mxu0 %v257_v3 }
  0x31   :  { %231 = vmatprep.subr.bf16.mxu0 %v357_v0 }
  0x34   :  { %232 = vmatpush3.bf16.msra.mxu0 %v258_v4 }
  0x35   :  { %233 = vmatprep.subr.bf16.mxu0 %v357_v0 }
  0x38   :  { %234 = vmatpush3.bf16.msra.mxu0 %v259_v5 }
  0x39   :  { %235 = vmatprep.subr.bf16.mxu0 %v357_v0 }
  0x3c   :  { %236 = vmatpush3.bf16.msra.mxu0 %v260_v6 }
  0x3d   :  { %237 = vmatprep.subr.bf16.mxu0 %v357_v0 }
  0x40   :  { %238 = vmatpush3.bf16.msra.mxu0 %v261_v7 }
  0x41   :  { %239 = vmatprep.subr.bf16.mxu0 %v357_v0 }
  0x44   :  { %240 = vmatpush3.bf16.msra.mxu0 %v262_v8 }
  0x47   :  { %242 = vmatmul.mubr.bf16.vlgmr.msra.gmra.mxu0 %v263_v9 }
 0x107   :  { %v173_v11 = vpop.f32.mrf.mxu0 }
 0x108   :  { %v174_v12 = vadd.f32 %v206_v10, %v173_v11 }
 0x109   :  { %v243_v14 = vpop.f32.mrf.mxu0 }
 0x10a   :  { %v180_v15 = vmax.f32 %v174_v12, 0.0 }
 0x10b   :  { %v176_v16 = vpop.f32.mrf.mxu0 }
 0x10c   :  { %v184_v17 = vadd.f32 %v182_v13, %v180_v15  ;;  %v177_v18 = vadd.f32 %v206_v10, %v176_v16 }
 0x10d   :  { %v244_v20 = vpop.f32.mrf.mxu0 }
 0x10e   :  { %186 = vst [vmem:[#allocation8] sm:$0xff] %v184_v17  ;;  %v181_v21 = vmax.f32 %v177_v18, 0.0 }
 0x110   :  { %v185_v22 = vadd.f32 %v183_v19, %v181_v21 }
 0x112   :  { %187 = vst [vmem:[#allocation8 + $0x8] sm:$0xff] %v185_v22 }
 0x113   :  { %335 = shalt.err (!%p332_p5)
}
 0x114   :  { %199 = dma.vmem_to_hbm [thread:$0]  %s194_s8, 256, %s410_s4, [#allocation4], %s355_s1, %s355_s1, %s356_s30  }
 0x115   :  { %348 = dma.done.wait [#allocation4], 256  }
 0x116   :  { %349 = vsyncadd [#allocation4], 4294967040 }
 0x117   :  { %203 = vsyncpa [#allocation3], 1 }
 0x118   :  { %204 = vsyncpa [#allocation6], 1 }
 0x119   :  { %205 = vsyncpa [#allocation4], 1 }

</bundles_post_ra>
